<compile_context>
chip_gen: v7x
topology: tpu7x:2x2x1
jax: 0.10.0
libtpu: 0.0.40
codegen_flags: <defaults>
</compile_context>

<pallas_src>
import functools
import math

import jax
import jax.numpy as jnp
from jax import lax
from jax.experimental import pallas as pl
from jax.experimental.pallas import tpu as pltpu


# ------------------------------- kernel ------------------------------------ #

def _mha_kernel(n_head, d_k, scale, eps,
                q_ref, k_ref, v_ref,
                wq_ref, bq_ref, wk_ref, bk_ref, wv_ref, bv_ref,
                wfc_ref, bfc_ref, g_ref, beta_ref,
                out_ref, attn_ref):
    """Fused MHA for one batch element: proj -> attention -> fc -> +res -> LN."""
    q = q_ref[0]            # (S, D)
    k = k_ref[0]            # (S, D)
    v = v_ref[0]            # (S, D)

    # Packed per-head projections: one lane-dense (S,D)@(D,D) matmul each.
    # Column block h*d_k:(h+1)*d_k of the result is head h's projection.
    qh = jnp.dot(q, wq_ref[...], preferred_element_type=jnp.float32) + bq_ref[...]
    kh = jnp.dot(k, wk_ref[...], preferred_element_type=jnp.float32) + bk_ref[...]
    vh = jnp.dot(v, wv_ref[...], preferred_element_type=jnp.float32) + bv_ref[...]

    # Fold the 1/sqrt(d_k) scale into q (S*d_k work instead of S*S).
    qh = qh * scale

    # Per-head attention, fully in VMEM / vregs (static unrolled loop).
    ctx_parts = []
    for h in range(n_head):
        sl = slice(h * d_k, (h + 1) * d_k)
        qh_h = qh[:, sl]    # (S, d_k)
        kh_h = kh[:, sl]
        vh_h = vh[:, sl]
        # scores = q @ k^T without materializing a transpose.
        s = lax.dot_general(qh_h, kh_h, (((1,), (1,)), ((), ())),
                            preferred_element_type=jnp.float32)    # (S, S)
        m = jnp.max(s, axis=-1, keepdims=True)
        e = jnp.exp(s - m)
        denom = jnp.sum(e, axis=-1, keepdims=True)
        p = e * pl.reciprocal(denom)                               # softmax
        attn_ref[0, h] = p
        ctx_parts.append(jnp.dot(p, vh_h, preferred_element_type=jnp.float32))

    # Heads are already laid out along the feature axis -> concatenated layout.
    concat = jnp.concatenate(ctx_parts, axis=-1)                   # (S, D)

    # fc + residual + LayerNorm (biased variance, matching torch).
    y = jnp.dot(concat, wfc_ref[...], preferred_element_type=jnp.float32) + bfc_ref[...]
    y = y + q                                                      # residual = query
    mean = jnp.mean(y, axis=-1, keepdims=True)
    var = jnp.mean((y - mean) ** 2, axis=-1, keepdims=True)
    yn = (y - mean) * lax.rsqrt(var + eps)
    out_ref[0] = yn * g_ref[...] + beta_ref[...]


# ------------------------------- wrapper ------------------------------------ #

def multi_head_attention(query, key, val, params, n_head):
    B, S, D = query.shape
    d_k = D // n_head
    f32 = jnp.float32

    # Pack per-head projection weights (H, D, d_k) -> (D, H*d_k) so one matmul
    # produces all heads, with head h occupying columns h*d_k:(h+1)*d_k.
    def pack_w(w):
        return jnp.transpose(w, (1, 0, 2)).reshape(D, n_head * d_k)

    def pack_b(b):                      # (H, 1, d_k) -> (1, H*d_k)
        return b.reshape(1, n_head * d_k)

    wq_p, wk_p, wv_p = pack_w(params["wq"]), pack_w(params["wk"]), pack_w(params["wv"])
    bq_p, bk_p, bv_p = pack_b(params["bq"]), pack_b(params["bk"]), pack_b(params["bv"])

    batch_spec = pl.BlockSpec((1, S, D), lambda b: (b, 0, 0))
    wmat_spec = pl.BlockSpec((D, D), lambda b: (0, 0))       # constant -> VMEM resident
    wvec_spec = pl.BlockSpec((1, D), lambda b: (0, 0))

    kernel = functools.partial(_mha_kernel, n_head, d_k, 1.0 / math.sqrt(d_k), 1e-5)

    features, attn_w = pl.pallas_call(
        kernel,
        out_shape=(jax.ShapeDtypeStruct((B, S, D), f32),
                   jax.ShapeDtypeStruct((B, n_head, S, S), f32)),
        grid=(B,),
        in_specs=[
            batch_spec,          # query
            batch_spec,          # key
            batch_spec,          # val
            wmat_spec, wvec_spec,    # Wq packed, bq packed
            wmat_spec, wvec_spec,    # Wk packed, bk packed
            wmat_spec, wvec_spec,    # Wv packed, bv packed
            wmat_spec, wvec_spec,    # fc weight (in, out), fc bias
            wvec_spec, wvec_spec,    # LN gamma, LN beta
        ],
        out_specs=(batch_spec,
                   pl.BlockSpec((1, n_head, S, S), lambda b: (b, 0, 0, 0))),
        compiler_params=pltpu.CompilerParams(
            dimension_semantics=("parallel",)),       # shards batch across TCs (v7x)
    )(query, key, val,
      wq_p, bq_p, wk_p, bk_p, wv_p, bv_p,
      params["w_fc"], params["b_fc"],
      params["ln_gamma"], params["ln_beta"])

    # TODO(synk): key_structure / val_structure structural-attention branch and
    # attention_mask are not implemented (module is exercised with None here).
    return features, attn_w


# --------------------------- parameter init -------------------------------- #

def init_params(key, d_model, n_head):
    d_k = d_model // n_head
    keys = jax.random.split(key, 8)

    def xavier(k, shape, fan_in, fan_out):
        std = math.sqrt(2.0 / (fan_in + fan_out))
        return std * jax.random.normal(k, shape, dtype=jnp.float32)

    def bias_uniform(k, shape, fan_in):
        bound = 1.0 / math.sqrt(fan_in)
        return jax.random.uniform(k, shape, dtype=jnp.float32,
                                  minval=-bound, maxval=bound)

    params = {
        # per-head projection weights stored as (H, d_model, d_k) so x @ W
        "wq": xavier(keys[0], (n_head, d_model, d_k), d_model, d_k),
        "wk": xavier(keys[1], (n_head, d_model, d_k), d_model, d_k),
        "wv": xavier(keys[2], (n_head, d_model, d_k), d_model, d_k),
        "bq": bias_uniform(keys[3], (n_head, 1, d_k), d_model),
        "bk": bias_uniform(keys[4], (n_head, 1, d_k), d_model),
        "bv": bias_uniform(keys[5], (n_head, 1, d_k), d_model),
        "w_fc": xavier(keys[6], (d_model, d_model), d_model, d_model),
        "b_fc": bias_uniform(keys[7], (1, d_model), d_model),
        "ln_gamma": jnp.ones((1, d_model), jnp.float32),
        "ln_beta": jnp.zeros((1, d_model), jnp.float32),
    }
    return params


# ------------------------ pure-JAX reference check ------------------------- #

def reference(query, key, val, params, n_head):
    B, S, D = query.shape
    d_k = D // n_head
    qh = jnp.einsum("bsd,hde->bhse", query, params["wq"]) + params["bq"][None]
    kh = jnp.einsum("bsd,hde->bhse", key, params["wk"]) + params["bk"][None]
    vh = jnp.einsum("bsd,hde->bhse", val, params["wv"]) + params["bv"][None]
    s = jnp.einsum("bhqe,bhke->bhqk", qh, kh) / math.sqrt(d_k)
    p = jax.nn.softmax(s, axis=-1)
    ctx = jnp.einsum("bhqk,bhke->bhqe", p, vh)
    concat = ctx.transpose(0, 2, 1, 3).reshape(B, S, D)
    y = concat @ params["w_fc"] + params["b_fc"] + query
    mean = y.mean(-1, keepdims=True)
    var = ((y - mean) ** 2).mean(-1, keepdims=True)
    yn = (y - mean) / jnp.sqrt(var + 1e-5)
    return yn * params["ln_gamma"] + params["ln_beta"], p


# --------------------------------- main ------------------------------------ #

if __name__ == "__main__":
    B, S, D, H = 2, 8, 32, 4           # batch, seq, d_model, n_head  (d_k = 8)
    root = jax.random.PRNGKey(0)
    k_p, k_q, k_k, k_v = jax.random.split(root, 4)

    params = init_params(k_p, D, H)
    query = jax.random.normal(k_q, (B, S, D), dtype=jnp.float32)
    key = jax.random.normal(k_k, (B, S, D), dtype=jnp.float32)
    val = jax.random.normal(k_v, (B, S, D), dtype=jnp.float32)

    features, attn_w = multi_head_attention(query, key, val, params, H)
    features = jax.block_until_ready(features)
    attn_w = jax.block_until_ready(attn_w)

    ref_feat, ref_attn = reference(query, key, val, params, H)
    assert features.shape == (B, S, D)
    assert attn_w.shape == (B, H, S, S)
    assert jnp.allclose(features, ref_feat, atol=1e-4, rtol=1e-4)
    assert jnp.allclose(attn_w, ref_attn, atol=1e-5, rtol=1e-5)

    print("KERNEL_OK")
</pallas_src>

<mosaic_0001>
module attributes {stable_mosaic.version = 11 : i64} {
  func.func @_mha_kernel(%arg0: i32, %arg1: memref<1x8x32xf32, #tpu.memory_space<vmem>>, %arg2: memref<1x8x32xf32, #tpu.memory_space<vmem>>, %arg3: memref<1x8x32xf32, #tpu.memory_space<vmem>>, %arg4: memref<32x32xf32, #tpu.memory_space<vmem>>, %arg5: memref<1x32xf32, #tpu.memory_space<vmem>>, %arg6: memref<32x32xf32, #tpu.memory_space<vmem>>, %arg7: memref<1x32xf32, #tpu.memory_space<vmem>>, %arg8: memref<32x32xf32, #tpu.memory_space<vmem>>, %arg9: memref<1x32xf32, #tpu.memory_space<vmem>>, %arg10: memref<32x32xf32, #tpu.memory_space<vmem>>, %arg11: memref<1x32xf32, #tpu.memory_space<vmem>>, %arg12: memref<1x32xf32, #tpu.memory_space<vmem>>, %arg13: memref<1x32xf32, #tpu.memory_space<vmem>>, %arg14: memref<1x8x32xf32, #tpu.memory_space<vmem>>, %arg15: memref<1x4x8x8xf32, #tpu.memory_space<vmem>>) attributes {dimension_semantics = [#tpu.dimension_semantics<parallel>], iteration_bounds = array<i64: 2>, scalar_prefetch = 0 : i64, scratch_operands = 0 : i64, tpu.core_type = #tpu.core_type<tc>, window_params = [{transform_indices = @transform_0, window_bounds = array<i64: 1, 8, 32>}, {transform_indices = @transform_1, window_bounds = array<i64: 1, 8, 32>}, {transform_indices = @transform_2, window_bounds = array<i64: 1, 8, 32>}, {pipeline_mode = #tpu.pipeline_mode<synchronous>, transform_indices = @transform_3, window_bounds = array<i64: 32, 32>}, {pipeline_mode = #tpu.pipeline_mode<synchronous>, transform_indices = @transform_4, window_bounds = array<i64: 1, 32>}, {pipeline_mode = #tpu.pipeline_mode<synchronous>, transform_indices = @transform_5, window_bounds = array<i64: 32, 32>}, {pipeline_mode = #tpu.pipeline_mode<synchronous>, transform_indices = @transform_6, window_bounds = array<i64: 1, 32>}, {pipeline_mode = #tpu.pipeline_mode<synchronous>, transform_indices = @transform_7, window_bounds = array<i64: 32, 32>}, {pipeline_mode = #tpu.pipeline_mode<synchronous>, transform_indices = @transform_8, window_bounds = array<i64: 1, 32>}, {pipeline_mode = #tpu.pipeline_mode<synchronous>, transform_indices = @transform_9, window_bounds = array<i64: 32, 32>}, {pipeline_mode = #tpu.pipeline_mode<synchronous>, transform_indices = @transform_10, window_bounds = array<i64: 1, 32>}, {pipeline_mode = #tpu.pipeline_mode<synchronous>, transform_indices = @transform_11, window_bounds = array<i64: 1, 32>}, {pipeline_mode = #tpu.pipeline_mode<synchronous>, transform_indices = @transform_12, window_bounds = array<i64: 1, 32>}, {transform_indices = @transform_13, window_bounds = array<i64: 1, 8, 32>}, {transform_indices = @transform_14, window_bounds = array<i64: 1, 4, 8, 8>}]} {
    %c0 = arith.constant 0 : index
    %c0_0 = arith.constant 0 : index
    %c0_1 = arith.constant 0 : index
    %0 = vector.load %arg1[%c0, %c0_0, %c0_1] : memref<1x8x32xf32, #tpu.memory_space<vmem>>, vector<1x8x32xf32>
    %1 = vector.shape_cast %0 : vector<1x8x32xf32> to vector<8x32xf32>
    %c0_2 = arith.constant 0 : index
    %c0_3 = arith.constant 0 : index
    %c0_4 = arith.constant 0 : index
    %2 = vector.load %arg2[%c0_2, %c0_3, %c0_4] : memref<1x8x32xf32, #tpu.memory_space<vmem>>, vector<1x8x32xf32>
    %3 = vector.shape_cast %2 : vector<1x8x32xf32> to vector<8x32xf32>
    %c0_5 = arith.constant 0 : index
    %c0_6 = arith.constant 0 : index
    %c0_7 = arith.constant 0 : index
    %4 = vector.load %arg3[%c0_5, %c0_6, %c0_7] : memref<1x8x32xf32, #tpu.memory_space<vmem>>, vector<1x8x32xf32>
    %5 = vector.shape_cast %4 : vector<1x8x32xf32> to vector<8x32xf32>
    %c0_8 = arith.constant 0 : index
    %c0_9 = arith.constant 0 : index
    %6 = vector.load %arg4[%c0_8, %c0_9] : memref<32x32xf32, #tpu.memory_space<vmem>>, vector<32x32xf32>
    %cst = arith.constant dense<0.000000e+00> : vector<8x32xf32>
    %7 = tpu.matmul %1, %6, %cst {dimension_numbers = #tpu.dot_dimension_numbers<[1], [0], [0], [1], [0, 0, 1, 1], [], []>} : vector<8x32xf32>, vector<32x32xf32>, vector<8x32xf32> -> vector<8x32xf32>
    %c0_10 = arith.constant 0 : index
    %c0_11 = arith.constant 0 : index
    %8 = vector.load %arg5[%c0_10, %c0_11] : memref<1x32xf32, #tpu.memory_space<vmem>>, vector<1x32xf32>
    %9 = vector.broadcast %8 : vector<1x32xf32> to vector<8x32xf32>
    %10 = arith.addf %7, %9 : vector<8x32xf32>
    %c0_12 = arith.constant 0 : index
    %c0_13 = arith.constant 0 : index
    %11 = vector.load %arg6[%c0_12, %c0_13] : memref<32x32xf32, #tpu.memory_space<vmem>>, vector<32x32xf32>
    %cst_14 = arith.constant dense<0.000000e+00> : vector<8x32xf32>
    %12 = tpu.matmul %3, %11, %cst_14 {dimension_numbers = #tpu.dot_dimension_numbers<[1], [0], [0], [1], [0, 0, 1, 1], [], []>} : vector<8x32xf32>, vector<32x32xf32>, vector<8x32xf32> -> vector<8x32xf32>
    %c0_15 = arith.constant 0 : index
    %c0_16 = arith.constant 0 : index
    %13 = vector.load %arg7[%c0_15, %c0_16] : memref<1x32xf32, #tpu.memory_space<vmem>>, vector<1x32xf32>
    %14 = vector.broadcast %13 : vector<1x32xf32> to vector<8x32xf32>
    %15 = arith.addf %12, %14 : vector<8x32xf32>
    %c0_17 = arith.constant 0 : index
    %c0_18 = arith.constant 0 : index
    %16 = vector.load %arg8[%c0_17, %c0_18] : memref<32x32xf32, #tpu.memory_space<vmem>>, vector<32x32xf32>
    %cst_19 = arith.constant dense<0.000000e+00> : vector<8x32xf32>
    %17 = tpu.matmul %5, %16, %cst_19 {dimension_numbers = #tpu.dot_dimension_numbers<[1], [0], [0], [1], [0, 0, 1, 1], [], []>} : vector<8x32xf32>, vector<32x32xf32>, vector<8x32xf32> -> vector<8x32xf32>
    %c0_20 = arith.constant 0 : index
    %c0_21 = arith.constant 0 : index
    %18 = vector.load %arg9[%c0_20, %c0_21] : memref<1x32xf32, #tpu.memory_space<vmem>>, vector<1x32xf32>
    %19 = vector.broadcast %18 : vector<1x32xf32> to vector<8x32xf32>
    %20 = arith.addf %17, %19 : vector<8x32xf32>
    %cst_22 = arith.constant 0.353553385 : f32
    %21 = vector.broadcast %cst_22 : f32 to vector<8x32xf32>
    %22 = arith.mulf %10, %21 : vector<8x32xf32>
    %23 = vector.extract_strided_slice %22 {offsets = [0, 0], sizes = [8, 8], strides = [1, 1]} : vector<8x32xf32> to vector<8x8xf32>
    %24 = vector.extract_strided_slice %15 {offsets = [0, 0], sizes = [8, 8], strides = [1, 1]} : vector<8x32xf32> to vector<8x8xf32>
    %25 = vector.extract_strided_slice %20 {offsets = [0, 0], sizes = [8, 8], strides = [1, 1]} : vector<8x32xf32> to vector<8x8xf32>
    %cst_23 = arith.constant dense<0.000000e+00> : vector<8x8xf32>
    %26 = tpu.matmul %23, %24, %cst_23 {dimension_numbers = #tpu.dot_dimension_numbers<[1], [1], [0], [0], [0, 0, 1, 0], [], []>} : vector<8x8xf32>, vector<8x8xf32>, vector<8x8xf32> -> vector<8x8xf32>
    %cst_24 = arith.constant dense<0xFF800000> : vector<8xf32>
    %27 = vector.multi_reduction <maximumf>, %26, %cst_24 [1] : vector<8x8xf32> to vector<8xf32>
    %28 = vector.shape_cast %27 : vector<8xf32> to vector<8x1xf32>
    %29 = vector.broadcast %28 : vector<8x1xf32> to vector<8x8xf32>
    %30 = arith.subf %26, %29 : vector<8x8xf32>
    %31 = math.exp %30 : vector<8x8xf32>
    %cst_25 = arith.constant dense<0.000000e+00> : vector<8xf32>
    %32 = vector.multi_reduction <add>, %31, %cst_25 [1] : vector<8x8xf32> to vector<8xf32>
    %33 = vector.shape_cast %32 : vector<8xf32> to vector<8x1xf32>
    %34 = tpu.reciprocal %33 : vector<8x1xf32> -> vector<8x1xf32>
    %35 = vector.broadcast %34 : vector<8x1xf32> to vector<8x8xf32>
    %36 = arith.mulf %31, %35 : vector<8x8xf32>
    %c0_26 = arith.constant 0 : index
    %c0_27 = arith.constant 0 : index
    %c0_28 = arith.constant 0 : index
    %c0_29 = arith.constant 0 : index
    %37 = vector.load %arg15[%c0_26, %c0_27, %c0_28, %c0_29] : memref<1x4x8x8xf32, #tpu.memory_space<vmem>>, vector<1x1x8x8xf32>
    %38 = vector.shape_cast %37 : vector<1x1x8x8xf32> to vector<8x8xf32>
    %39 = vector.shape_cast %36 : vector<8x8xf32> to vector<1x1x8x8xf32>
    tpu.vector_store %arg15[%c0_26, %c0_27, %c0_28, %c0_29], %39 {strides = array<i32>} : memref<1x4x8x8xf32, #tpu.memory_space<vmem>>, vector<1x1x8x8xf32>,
    %cst_30 = arith.constant dense<0.000000e+00> : vector<8x8xf32>
    %40 = tpu.matmul %36, %25, %cst_30 {dimension_numbers = #tpu.dot_dimension_numbers<[1], [0], [0], [1], [0, 0, 1, 1], [], []>} : vector<8x8xf32>, vector<8x8xf32>, vector<8x8xf32> -> vector<8x8xf32>
    %41 = vector.extract_strided_slice %22 {offsets = [0, 8], sizes = [8, 8], strides = [1, 1]} : vector<8x32xf32> to vector<8x8xf32>
    %42 = vector.extract_strided_slice %15 {offsets = [0, 8], sizes = [8, 8], strides = [1, 1]} : vector<8x32xf32> to vector<8x8xf32>
    %43 = vector.extract_strided_slice %20 {offsets = [0, 8], sizes = [8, 8], strides = [1, 1]} : vector<8x32xf32> to vector<8x8xf32>
    %cst_31 = arith.constant dense<0.000000e+00> : vector<8x8xf32>
    %44 = tpu.matmul %41, %42, %cst_31 {dimension_numbers = #tpu.dot_dimension_numbers<[1], [1], [0], [0], [0, 0, 1, 0], [], []>} : vector<8x8xf32>, vector<8x8xf32>, vector<8x8xf32> -> vector<8x8xf32>
    %cst_32 = arith.constant dense<0xFF800000> : vector<8xf32>
    %45 = vector.multi_reduction <maximumf>, %44, %cst_32 [1] : vector<8x8xf32> to vector<8xf32>
    %46 = vector.shape_cast %45 : vector<8xf32> to vector<8x1xf32>
    %47 = vector.broadcast %46 : vector<8x1xf32> to vector<8x8xf32>
    %48 = arith.subf %44, %47 : vector<8x8xf32>
    %49 = math.exp %48 : vector<8x8xf32>
    %cst_33 = arith.constant dense<0.000000e+00> : vector<8xf32>
    %50 = vector.multi_reduction <add>, %49, %cst_33 [1] : vector<8x8xf32> to vector<8xf32>
    %51 = vector.shape_cast %50 : vector<8xf32> to vector<8x1xf32>
    %52 = tpu.reciprocal %51 : vector<8x1xf32> -> vector<8x1xf32>
    %53 = vector.broadcast %52 : vector<8x1xf32> to vector<8x8xf32>
    %54 = arith.mulf %49, %53 : vector<8x8xf32>
    %c0_34 = arith.constant 0 : index
    %c1 = arith.constant 1 : index
    %c0_35 = arith.constant 0 : index
    %c0_36 = arith.constant 0 : index
    %55 = vector.load %arg15[%c0_34, %c1, %c0_35, %c0_36] : memref<1x4x8x8xf32, #tpu.memory_space<vmem>>, vector<1x1x8x8xf32>
    %56 = vector.shape_cast %55 : vector<1x1x8x8xf32> to vector<8x8xf32>
    %57 = vector.shape_cast %54 : vector<8x8xf32> to vector<1x1x8x8xf32>
    tpu.vector_store %arg15[%c0_34, %c1, %c0_35, %c0_36], %57 {strides = array<i32>} : memref<1x4x8x8xf32, #tpu.memory_space<vmem>>, vector<1x1x8x8xf32>,
    %cst_37 = arith.constant dense<0.000000e+00> : vector<8x8xf32>
    %58 = tpu.matmul %54, %43, %cst_37 {dimension_numbers = #tpu.dot_dimension_numbers<[1], [0], [0], [1], [0, 0, 1, 1], [], []>} : vector<8x8xf32>, vector<8x8xf32>, vector<8x8xf32> -> vector<8x8xf32>
    %59 = vector.extract_strided_slice %22 {offsets = [0, 16], sizes = [8, 8], strides = [1, 1]} : vector<8x32xf32> to vector<8x8xf32>
    %60 = vector.extract_strided_slice %15 {offsets = [0, 16], sizes = [8, 8], strides = [1, 1]} : vector<8x32xf32> to vector<8x8xf32>
    %61 = vector.extract_strided_slice %20 {offsets = [0, 16], sizes = [8, 8], strides = [1, 1]} : vector<8x32xf32> to vector<8x8xf32>
    %cst_38 = arith.constant dense<0.000000e+00> : vector<8x8xf32>
    %62 = tpu.matmul %59, %60, %cst_38 {dimension_numbers = #tpu.dot_dimension_numbers<[1], [1], [0], [0], [0, 0, 1, 0], [], []>} : vector<8x8xf32>, vector<8x8xf32>, vector<8x8xf32> -> vector<8x8xf32>
    %cst_39 = arith.constant dense<0xFF800000> : vector<8xf32>
    %63 = vector.multi_reduction <maximumf>, %62, %cst_39 [1] : vector<8x8xf32> to vector<8xf32>
    %64 = vector.shape_cast %63 : vector<8xf32> to vector<8x1xf32>
    %65 = vector.broadcast %64 : vector<8x1xf32> to vector<8x8xf32>
    %66 = arith.subf %62, %65 : vector<8x8xf32>
    %67 = math.exp %66 : vector<8x8xf32>
    %cst_40 = arith.constant dense<0.000000e+00> : vector<8xf32>
    %68 = vector.multi_reduction <add>, %67, %cst_40 [1] : vector<8x8xf32> to vector<8xf32>
    %69 = vector.shape_cast %68 : vector<8xf32> to vector<8x1xf32>
    %70 = tpu.reciprocal %69 : vector<8x1xf32> -> vector<8x1xf32>
    %71 = vector.broadcast %70 : vector<8x1xf32> to vector<8x8xf32>
    %72 = arith.mulf %67, %71 : vector<8x8xf32>
    %c0_41 = arith.constant 0 : index
    %c2 = arith.constant 2 : index
    %c0_42 = arith.constant 0 : index
    %c0_43 = arith.constant 0 : index
    %73 = vector.load %arg15[%c0_41, %c2, %c0_42, %c0_43] : memref<1x4x8x8xf32, #tpu.memory_space<vmem>>, vector<1x1x8x8xf32>
    %74 = vector.shape_cast %73 : vector<1x1x8x8xf32> to vector<8x8xf32>
    %75 = vector.shape_cast %72 : vector<8x8xf32> to vector<1x1x8x8xf32>
    tpu.vector_store %arg15[%c0_41, %c2, %c0_42, %c0_43], %75 {strides = array<i32>} : memref<1x4x8x8xf32, #tpu.memory_space<vmem>>, vector<1x1x8x8xf32>,
    %cst_44 = arith.constant dense<0.000000e+00> : vector<8x8xf32>
    %76 = tpu.matmul %72, %61, %cst_44 {dimension_numbers = #tpu.dot_dimension_numbers<[1], [0], [0], [1], [0, 0, 1, 1], [], []>} : vector<8x8xf32>, vector<8x8xf32>, vector<8x8xf32> -> vector<8x8xf32>
    %77 = vector.extract_strided_slice %22 {offsets = [0, 24], sizes = [8, 8], strides = [1, 1]} : vector<8x32xf32> to vector<8x8xf32>
    %78 = vector.extract_strided_slice %15 {offsets = [0, 24], sizes = [8, 8], strides = [1, 1]} : vector<8x32xf32> to vector<8x8xf32>
    %79 = vector.extract_strided_slice %20 {offsets = [0, 24], sizes = [8, 8], strides = [1, 1]} : vector<8x32xf32> to vector<8x8xf32>
    %cst_45 = arith.constant dense<0.000000e+00> : vector<8x8xf32>
    %80 = tpu.matmul %77, %78, %cst_45 {dimension_numbers = #tpu.dot_dimension_numbers<[1], [1], [0], [0], [0, 0, 1, 0], [], []>} : vector<8x8xf32>, vector<8x8xf32>, vector<8x8xf32> -> vector<8x8xf32>
    %cst_46 = arith.constant dense<0xFF800000> : vector<8xf32>
    %81 = vector.multi_reduction <maximumf>, %80, %cst_46 [1] : vector<8x8xf32> to vector<8xf32>
    %82 = vector.shape_cast %81 : vector<8xf32> to vector<8x1xf32>
    %83 = vector.broadcast %82 : vector<8x1xf32> to vector<8x8xf32>
    %84 = arith.subf %80, %83 : vector<8x8xf32>
    %85 = math.exp %84 : vector<8x8xf32>
    %cst_47 = arith.constant dense<0.000000e+00> : vector<8xf32>
    %86 = vector.multi_reduction <add>, %85, %cst_47 [1] : vector<8x8xf32> to vector<8xf32>
    %87 = vector.shape_cast %86 : vector<8xf32> to vector<8x1xf32>
    %88 = tpu.reciprocal %87 : vector<8x1xf32> -> vector<8x1xf32>
    %89 = vector.broadcast %88 : vector<8x1xf32> to vector<8x8xf32>
    %90 = arith.mulf %85, %89 : vector<8x8xf32>
    %c0_48 = arith.constant 0 : index
    %c3 = arith.constant 3 : index
    %c0_49 = arith.constant 0 : index
    %c0_50 = arith.constant 0 : index
    %91 = vector.load %arg15[%c0_48, %c3, %c0_49, %c0_50] : memref<1x4x8x8xf32, #tpu.memory_space<vmem>>, vector<1x1x8x8xf32>
    %92 = vector.shape_cast %91 : vector<1x1x8x8xf32> to vector<8x8xf32>
    %93 = vector.shape_cast %90 : vector<8x8xf32> to vector<1x1x8x8xf32>
    tpu.vector_store %arg15[%c0_48, %c3, %c0_49, %c0_50], %93 {strides = array<i32>} : memref<1x4x8x8xf32, #tpu.memory_space<vmem>>, vector<1x1x8x8xf32>,
    %cst_51 = arith.constant dense<0.000000e+00> : vector<8x8xf32>
    %94 = tpu.matmul %90, %79, %cst_51 {dimension_numbers = #tpu.dot_dimension_numbers<[1], [0], [0], [1], [0, 0, 1, 1], [], []>} : vector<8x8xf32>, vector<8x8xf32>, vector<8x8xf32> -> vector<8x8xf32>
    %95 = tpu.concatenate %40, %58, %76, %94 in 1 : vector<8x8xf32>, vector<8x8xf32>, vector<8x8xf32>, vector<8x8xf32> -> vector<8x32xf32>
    %c0_52 = arith.constant 0 : index
    %c0_53 = arith.constant 0 : index
    %96 = vector.load %arg10[%c0_52, %c0_53] : memref<32x32xf32, #tpu.memory_space<vmem>>, vector<32x32xf32>
    %cst_54 = arith.constant dense<0.000000e+00> : vector<8x32xf32>
    %97 = tpu.matmul %95, %96, %cst_54 {dimension_numbers = #tpu.dot_dimension_numbers<[1], [0], [0], [1], [0, 0, 1, 1], [], []>} : vector<8x32xf32>, vector<32x32xf32>, vector<8x32xf32> -> vector<8x32xf32>
    %c0_55 = arith.constant 0 : index
    %c0_56 = arith.constant 0 : index
    %98 = vector.load %arg11[%c0_55, %c0_56] : memref<1x32xf32, #tpu.memory_space<vmem>>, vector<1x32xf32>
    %99 = vector.broadcast %98 : vector<1x32xf32> to vector<8x32xf32>
    %100 = arith.addf %97, %99 : vector<8x32xf32>
    %101 = arith.addf %100, %1 : vector<8x32xf32>
    %cst_57 = arith.constant dense<0.000000e+00> : vector<8xf32>
    %102 = vector.multi_reduction <add>, %101, %cst_57 [1] : vector<8x32xf32> to vector<8xf32>
    %103 = vector.shape_cast %102 : vector<8xf32> to vector<8x1xf32>
    %cst_58 = arith.constant 3.200000e+01 : f32
    %104 = vector.broadcast %cst_58 : f32 to vector<8x1xf32>
    %105 = arith.divf %103, %104 : vector<8x1xf32>
    %106 = vector.broadcast %105 : vector<8x1xf32> to vector<8x32xf32>
    %107 = arith.subf %101, %106 : vector<8x32xf32>
    %108 = arith.mulf %107, %107 : vector<8x32xf32>
    %cst_59 = arith.constant dense<0.000000e+00> : vector<8xf32>
    %109 = vector.multi_reduction <add>, %108, %cst_59 [1] : vector<8x32xf32> to vector<8xf32>
    %110 = vector.shape_cast %109 : vector<8xf32> to vector<8x1xf32>
    %cst_60 = arith.constant 3.200000e+01 : f32
    %111 = vector.broadcast %cst_60 : f32 to vector<8x1xf32>
    %112 = arith.divf %110, %111 : vector<8x1xf32>
    %113 = vector.broadcast %105 : vector<8x1xf32> to vector<8x32xf32>
    %114 = arith.subf %101, %113 : vector<8x32xf32>
    %cst_61 = arith.constant 9.99999974E-6 : f32
    %115 = vector.broadcast %cst_61 : f32 to vector<8x1xf32>
    %116 = arith.addf %112, %115 : vector<8x1xf32>
    %117 = math.rsqrt %116 : vector<8x1xf32>
    %118 = vector.broadcast %117 : vector<8x1xf32> to vector<8x32xf32>
    %119 = arith.mulf %114, %118 : vector<8x32xf32>
    %c0_62 = arith.constant 0 : index
    %c0_63 = arith.constant 0 : index
    %120 = vector.load %arg12[%c0_62, %c0_63] : memref<1x32xf32, #tpu.memory_space<vmem>>, vector<1x32xf32>
    %121 = vector.broadcast %120 : vector<1x32xf32> to vector<8x32xf32>
    %122 = arith.mulf %119, %121 : vector<8x32xf32>
    %c0_64 = arith.constant 0 : index
    %c0_65 = arith.constant 0 : index
    %123 = vector.load %arg13[%c0_64, %c0_65] : memref<1x32xf32, #tpu.memory_space<vmem>>, vector<1x32xf32>
    %124 = vector.broadcast %123 : vector<1x32xf32> to vector<8x32xf32>
    %125 = arith.addf %122, %124 : vector<8x32xf32>
    %c0_66 = arith.constant 0 : index
    %c0_67 = arith.constant 0 : index
    %c0_68 = arith.constant 0 : index
    %126 = vector.load %arg14[%c0_66, %c0_67, %c0_68] : memref<1x8x32xf32, #tpu.memory_space<vmem>>, vector<1x8x32xf32>
    %127 = vector.shape_cast %126 : vector<1x8x32xf32> to vector<8x32xf32>
    %128 = vector.shape_cast %125 : vector<8x32xf32> to vector<1x8x32xf32>
    tpu.vector_store %arg14[%c0_66, %c0_67, %c0_68], %128 {strides = array<i32>} : memref<1x8x32xf32, #tpu.memory_space<vmem>>, vector<1x8x32xf32>,
    return
  }
  func.func @transform_0(%arg0: i32) -> (i32, i32, i32) {
    %c0_i32 = arith.constant 0 : i32
    %c0_i32_0 = arith.constant 0 : i32
    %c0_i32_1 = arith.constant 0 : i32
    return %arg0, %c0_i32, %c0_i32_0 : i32, i32, i32
  }
  func.func @transform_1(%arg0: i32) -> (i32, i32, i32) {
    %c0_i32 = arith.constant 0 : i32
    %c0_i32_0 = arith.constant 0 : i32
    %c0_i32_1 = arith.constant 0 : i32
    return %arg0, %c0_i32, %c0_i32_0 : i32, i32, i32
  }
  func.func @transform_2(%arg0: i32) -> (i32, i32, i32) {
    %c0_i32 = arith.constant 0 : i32
    %c0_i32_0 = arith.constant 0 : i32
    %c0_i32_1 = arith.constant 0 : i32
    return %arg0, %c0_i32, %c0_i32_0 : i32, i32, i32
  }
  func.func @transform_3(%arg0: i32) -> (i32, i32) {
    %c0_i32 = arith.constant 0 : i32
    %c0_i32_0 = arith.constant 0 : i32
    %c0_i32_1 = arith.constant 0 : i32
    return %c0_i32, %c0_i32_0 : i32, i32
  }
  func.func @transform_4(%arg0: i32) -> (i32, i32) {
    %c0_i32 = arith.constant 0 : i32
    %c0_i32_0 = arith.constant 0 : i32
    %c0_i32_1 = arith.constant 0 : i32
    return %c0_i32, %c0_i32_0 : i32, i32
  }
  func.func @transform_5(%arg0: i32) -> (i32, i32) {
    %c0_i32 = arith.constant 0 : i32
    %c0_i32_0 = arith.constant 0 : i32
    %c0_i32_1 = arith.constant 0 : i32
    return %c0_i32, %c0_i32_0 : i32, i32
  }
  func.func @transform_6(%arg0: i32) -> (i32, i32) {
    %c0_i32 = arith.constant 0 : i32
    %c0_i32_0 = arith.constant 0 : i32
    %c0_i32_1 = arith.constant 0 : i32
    return %c0_i32, %c0_i32_0 : i32, i32
  }
  func.func @transform_7(%arg0: i32) -> (i32, i32) {
    %c0_i32 = arith.constant 0 : i32
    %c0_i32_0 = arith.constant 0 : i32
    %c0_i32_1 = arith.constant 0 : i32
    return %c0_i32, %c0_i32_0 : i32, i32
  }
  func.func @transform_8(%arg0: i32) -> (i32, i32) {
    %c0_i32 = arith.constant 0 : i32
    %c0_i32_0 = arith.constant 0 : i32
    %c0_i32_1 = arith.constant 0 : i32
    return %c0_i32, %c0_i32_0 : i32, i32
  }
  func.func @transform_9(%arg0: i32) -> (i32, i32) {
    %c0_i32 = arith.constant 0 : i32
    %c0_i32_0 = arith.constant 0 : i32
    %c0_i32_1 = arith.constant 0 : i32
    return %c0_i32, %c0_i32_0 : i32, i32
  }
  func.func @transform_10(%arg0: i32) -> (i32, i32) {
    %c0_i32 = arith.constant 0 : i32
    %c0_i32_0 = arith.constant 0 : i32
    %c0_i32_1 = arith.constant 0 : i32
    return %c0_i32, %c0_i32_0 : i32, i32
  }
  func.func @transform_11(%arg0: i32) -> (i32, i32) {
    %c0_i32 = arith.constant 0 : i32
    %c0_i32_0 = arith.constant 0 : i32
    %c0_i32_1 = arith.constant 0 : i32
    return %c0_i32, %c0_i32_0 : i32, i32
  }
  func.func @transform_12(%arg0: i32) -> (i32, i32) {
    %c0_i32 = arith.constant 0 : i32
    %c0_i32_0 = arith.constant 0 : i32
    %c0_i32_1 = arith.constant 0 : i32
    return %c0_i32, %c0_i32_0 : i32, i32
  }
  func.func @transform_13(%arg0: i32) -> (i32, i32, i32) {
    %c0_i32 = arith.constant 0 : i32
    %c0_i32_0 = arith.constant 0 : i32
    %c0_i32_1 = arith.constant 0 : i32
    return %arg0, %c0_i32, %c0_i32_0 : i32, i32, i32
  }
  func.func @transform_14(%arg0: i32) -> (i32, i32, i32, i32) {
    %c0_i32 = arith.constant 0 : i32
    %c0_i32_0 = arith.constant 0 : i32
    %c0_i32_1 = arith.constant 0 : i32
    %c0_i32_2 = arith.constant 0 : i32
    return %arg0, %c0_i32, %c0_i32_0, %c0_i32_1 : i32, i32, i32, i32
  }
}

</mosaic_0001>

<bundles_post_ra>
// kernel: tpu_custom_call.1
= control target key start
LH: loop header
LB: loop body
LE: loop exit
PB: predicated region body
PF: predicated region fallthrough
CT: control target
= control target key end

     0   :  { %s3159_s0 = inlined_call_operand.hbm [shape: f32[2,8,32], index: 0, kind: input, shape index: {}]   ;;  %s3160_s1 = inlined_call_operand.hbm [shape: f32[2,8,32], index: 1, kind: input, shape index: {}]   ;;  %s3161_s2 = inlined_call_operand.hbm [shape: f32[2,8,32], index: 2, kind: input, shape index: {}]   ;;  %s3162_s3 = inlined_call_operand.hbm [shape: f32[32,32], index: 3, kind: input, shape index: {}]   ;;  %s3163_s4 = inlined_call_operand.vmem [shape: f32[1,32], index: 4, kind: input, shape index: {}]   ;;  %s3164_s5 = inlined_call_operand.hbm [shape: f32[32,32], index: 5, kind: input, shape index: {}]   ;;  %s3165_s6 = inlined_call_operand.vmem [shape: f32[1,32], index: 6, kind: input, shape index: {}]   ;;  %s3166_s7 = inlined_call_operand.hbm [shape: f32[32,32], index: 7, kind: input, shape index: {}]   ;;  %s3167_s8 = inlined_call_operand.hbm [shape: f32[1,32], index: 8, kind: input, shape index: {}]   ;;  %s3168_s9 = inlined_call_operand.vmem [shape: f32[32,32], index: 9, kind: input, shape index: {}]   ;;  %s3169_s10 = inlined_call_operand.vmem [shape: f32[1,32], index: 10, kind: input, shape index: {}]   ;;  %s3170_s11 = inlined_call_operand.vmem [shape: f32[1,32], index: 11, kind: input, shape index: {}]   ;;  %s3171_s12 = inlined_call_operand.vmem [shape: f32[1,32], index: 12, kind: input, shape index: {}]   ;;  %s3172_s13 = inlined_call_operand.hbm [shape: f32[2,8,32], index: 13, kind: output, shape index: {0}]   ;;  %s3173_s14 = inlined_call_operand.hbm [shape: f32[2,4,8,8], index: 14, kind: output, shape index: {1}]  }
   0x1   :  { %3199 = sst [smem:[#allocation29_spill]] %s3160_s1 }
   0x2   :  { %3200 = sst [smem:[#allocation30_spill]] %s3162_s3 }
   0x3   :  { %3201 = sst [smem:[#allocation31_spill]] %s3163_s4 }
   0x4   :  { %3202 = sst [smem:[#allocation32_spill]] %s3166_s7 }
   0x5   :  { %3203 = sst [smem:[#allocation33_spill]] %s3168_s9 }
   0x6   :  { %3204 = sst [smem:[#allocation34_spill]] %s3169_s10 }
   0x7   :  { %3205 = sst [smem:[#allocation35_spill]] %s3170_s11 }
   0x8   :  { %3206 = sst [smem:[#allocation36_spill]] %s3171_s12 }
   0x9   :  { %3207 = sst [smem:[#allocation37_spill]] %s3172_s13 }
   0xa   :  { %3208 = sst [smem:[#allocation38_spill]] %s3173_s14 }
   0xb   :  { %20 = vsyncpa [#allocation3], 0 }
   0xc   :  { %22 = vsyncpa [#allocation3 + $0x1], 0 }
   0xd   :  { %23 = vsyncpa [#allocation6], 0 }
   0xe   :  { %25 = vsyncpa [#allocation6 + $0x1], 0 }
   0xf   :  { %26 = vsyncpa [#allocation9], 0 }
  0x10   :  { %27 = vsyncpa [#allocation12], 0 }
  0x11   :  { %28 = vsyncpa [#allocation4], 0 }
  0x12   :  { %30 = vsyncpa [#allocation4 + $0x1], 0 }
  0x13   :  { %31 = vsyncpa [#allocation16], 0 }
  0x14   :  { %33 = vsyncpa [#allocation16 + $0x1], 0  ;;  %s2635_s29 = smov 0   ;;  %s2637_s30 = smov 0  }
  0x15   :  { %s2639_s15 = smov 0   ;;  %s2641_s16 = smov 0  }
  0x16 LB: > { %3209 = sst [smem:[#allocation23_spill]] %s2525_s29  ;;  %s2539_s17 = smov [#allocation8]   ;;  %s2537_s16 = sphi %s2641_s16, %s3254_s16   ;;  %s2533_s15 = sphi %s2639_s15, %s3258_s15   ;;  %s2529_s30 = sphi %s2637_s30, %s3257_s30   ;;  %s2525_s29 = sphi %s2635_s29, %s3256_s29  }
  0x17   : > { %3210 = sst [smem:[#allocation24_spill]] %s2537_s16  ;;  %s396_s18 = sshll.u32 %s2539_s17, 4  ;;  %s2661_s18 = int_to_ptr.vmem [resolvable:$true] %s396_s18 }
  0x18   : > { %s2656_s19 = sadd.s32 4294967295, %s2537_s16   ;;  %p1894_p0 = scmp.ge.s32.totalorder %s2537_s16, 1 }
  0x19   : > { %p3185_p1 = scmp.eq.s32.totalorder %s2656_s19, 0  ;;  %p384_p2 = scmp.lt.s32.totalorder %s2537_s16, 3 }
  0x1a   : > { %s2540_s21 = smov [#allocation11]   ;;  %s3213_s3 = sld [smem:[#allocation30_spill]] }
  0x1b   : > { %p2663_p3 = pnand %p1894_p0, %p384_p2  ;;  %s428_s22 = sshll.u32 %s2540_s21, 4  ;;  %s2676_s22 = int_to_ptr.vmem [resolvable:$true] %s428_s22 }
  0x1d   : > { %s3211_s20 = scalar_select %p2663_p3, 1, 0 }
  0x1e   : > { %p2119_p5 = pneg %p2663_p3 }
  0x20   : > { %p2672_p6 = pnand %p2119_p5, %p3185_p1  ;;  %s2225_s26 = scalar_lea.hbm %s3213_s3, 512 }
  0x21   : > { %p2226_p7 = scmp.ne.s32.totalorder %s3213_s3, %s2225_s26  ;;  %p2232_p11 = scmp.lt.u32.totalorder %s2225_s26, %s3213_s3 }
  0x22   : > { %s3212_s23 = scalar_select %p2672_p6, 1, 0 }
  0x23   : > { %p2686_p8 = pneg %p2672_p6 }
  0x25   : > { %s3214_s17 = scalar_select %p2686_p8, 1, 0 }
  0x26   : > { %p2228_p9 = pnand %p2686_p8, %p2226_p7 }
  0x28   : > { %p2229_p10 = pneg %p2228_p9 }
  0x2a   : > { %p2234_p12 = pnand %p2232_p11, %p2229_p10 }
  0x2c   : > { %2237 = shalt.err (!%p2234_p12)
}
  0x2d   : > { %s2238_s24 = scalar_lea.vmem %s2661_s18, 512  ;;  %p2246_p5 = scmp.lt.s32.totalorder %s2661_s18, %s2661_s18 }
  0x2e   : > { %p2239_p13 = scmp.ne.s32.totalorder %s2661_s18, %s2238_s24  ;;  %p2247_p4 = scmp.lt.s32.totalorder %s2238_s24, %s2238_s24 }
  0x30   : > { %p2241_p0 = pnand %p2239_p13, %p2686_p8  ;;  %p2248_p7 = por %p2247_p4, %p2246_p5 }
  0x32   : > { %p2242_p2 = pneg %p2241_p0 }
  0x34   : > { %p2249_p9 = pnand %p2248_p7, %p2242_p2 }
  0x36   : > { %2252 = shalt.err (!%p2249_p9)
}
  0x37   : > { %s3177_s25 = smov 128   ;;  %s3178_s13 = smov 8  }
  0x38   : > { %2122 = dma.hbm_to_vmem [thread:$0]  (!%p2672_p6), %s3213_s3, 512, %s2661_s18, [#allocation9], %s3177_s25, %s3177_s25, %s3178_s13  }
  0x39   : > { %s3215_s7 = sld [smem:[#allocation32_spill]] }
  0x3f   : > { %s2253_s24 = scalar_lea.hbm %s3215_s7, 512 }
  0x40   : > { %p2254_p4 = scmp.ne.s32.totalorder %s3215_s7, %s2253_s24  ;;  %p2260_p12 = scmp.lt.u32.totalorder %s2253_s24, %s3215_s7 }
  0x42   : > { %p2256_p10 = pnand %p2254_p4, %p2686_p8 }
  0x44   : > { %p2257_p11 = pneg %p2256_p10 }
  0x46   : > { %p2262_p13 = pnand %p2260_p12, %p2257_p11 }
  0x48   : > { %2265 = shalt.err (!%p2262_p13)
}
  0x49   : > { %s2266_s18 = scalar_lea.vmem %s2676_s22, 512  ;;  %p2274_p7 = scmp.lt.s32.totalorder %s2676_s22, %s2676_s22 }
  0x4a   : > { %p2267_p0 = scmp.ne.s32.totalorder %s2676_s22, %s2266_s18  ;;  %p2275_p9 = scmp.lt.s32.totalorder %s2266_s18, %s2266_s18 }
  0x4c   : > { %p2269_p2 = pnand %p2267_p0, %p2686_p8  ;;  %p2276_p4 = por %p2275_p9, %p2274_p7 }
  0x4e   : > { %p2270_p5 = pneg %p2269_p2 }
  0x50   : > { %p2277_p10 = pnand %p2276_p4, %p2270_p5 }
  0x52   : > { %2280 = shalt.err (!%p2277_p10)
}
  0x53   : > { %2128 = dma.hbm_to_vmem [thread:$0]  (!%p2672_p6), %s3215_s7, 512, %s2676_s22, [#allocation12], %s3177_s25, %s3177_s25, %s3178_s13  }
  0x54   : > { %s1893_s12 = sadd.s32 4294967294, %s2537_s16   ;;  %s2738_s14 = sadd.s32 1, %s2537_s16  }
  0x55   : > { %3216 = sst [smem:[#allocation25_spill]] %s2738_s14  ;;  %s43_s26 = ssub.s32 %s2537_s16, %s2738_s14 }
  0x56   : > { %s46_s27 = sadd.s32 1, %s2533_s15  ;;  %p44_p11 = scmp.eq.s32.totalorder %s43_s26, 0 }
  0x57   : > { %p53_p12 = scmp.ne.s32.totalorder %s2533_s15, %s2529_s30  ;;  %p54_p13 = scmp.eq.s32.totalorder %s2537_s16, 0 }
  0x58   : > { %p59_p0 = scmp.ne.s32.totalorder %s2529_s30, %s2525_s29  ;;  %p345_p7 = scmp.eq.s32.totalorder %s2656_s19, 1 }
  0x59   : > { %s2749_s28 = scalar_select %p44_p11, %s2533_s15, %s46_s27  }
  0x5a   : > { %p55_p2 = por %p54_p13, %p53_p12  ;;  %p2753_p5 = por %p3185_p1, %p59_p0 }
  0x5b   : > { %3217 = sst [smem:[#allocation26_spill]] %s2749_s28  ;;  %p351_p9 = scmp.eq.s32.totalorder %s1893_s12, 1 }
  0x5c   : > { %s3218_s21 = scalar_select %p2753_p5, 1, 0 }
  0x5d   : > { %p2153_p4 = scmp.lt.s32.totalorder %s2537_s16, 2  ;;  %s3179_s22 = sand.u32 1, %s2533_s15  }
  0x5e   : > { %p2760_p10 = por %p345_p7, %p53_p12  ;;  %p2764_p3 = por %p351_p9, %p59_p0 }
  0x5f   : > { %s2770_s10 = sshll.u32 %s3179_s22, 3  ;;  %s2773_s11 = sshll.u32 %s2537_s16, 7 }
  0x60   : > { %s3219_s24 = scalar_select %p2760_p10, 1, 0 }
  0x61   : > { %s3221_s18 = scalar_select %p2764_p3, 1, 0 }
  0x62   : > { %3220 = sst [smem:[#allocation27_spill]] %s3219_s24  ;;  %p2775_p11 = pnand %p2153_p4, %p55_p2 }
  0x63   : > { %3222 = sst [smem:[#allocation28_spill]] %s3221_s18  ;;  %s483_s12 = sand.u32 1, %s2537_s16  }
  0x64   : > { %s3223_s26 = scalar_select %p2775_p11, 1, 0 }
  0x65   : > { %s3224_s1 = sld [smem:[#allocation29_spill]]  ;;  %s487_s22 = scalar_lea.vmem [#allocation5], %s2770_s10 }
  0x66   : > { %s494_s3 = sshll.u32 %s487_s22, 4  ;;  %s2543_s7 = smov [#allocation10]   ;;  %s2787_s3 = int_to_ptr.vmem [resolvable:$true] %s494_s3 }
  0x67   : > { %s2789_s28 = sshll.u32 %s2543_s7, 4  ;;  %s2791_s14 = scalar_lea.sflag [#allocation6], %s483_s12  ;;  %s413_s28 = int_to_ptr.vmem [resolvable:$true] %s2789_s28 }
  0x68   : > { %p2797_p13 = pneg %p2775_p11 }
  0x6a   : > { %s3225_s25 = scalar_select %p2797_p13, 1, 0 }
  0x6b   : > { %s2784_s13 = scalar_lea.hbm %s3224_s1, %s2773_s11  ;;  %s2286_s16 = scalar_lea.hbm %s3224_s1, 256 }
  0x6c   : > { %s2281_s18 = scalar_lea.hbm %s2784_s13, 128  ;;  %p2287_p7 = scmp.lt.u32.totalorder %s2784_s13, %s3224_s1 }
  0x6d   : > { %p2282_p12 = scmp.ne.s32.totalorder %s2784_s13, %s2281_s18  ;;  %p2288_p9 = scmp.lt.u32.totalorder %s2286_s16, %s2281_s18 }
  0x6e   : > { %p2290_p1 = scmp.lt.u32.totalorder %s2281_s18, %s2784_s13 }
  0x6f   : > { %p2284_p0 = pnand %p2797_p13, %p2282_p12  ;;  %p2289_p4 = por %p2288_p9, %p2287_p7 }
  0x71   : > { %p2285_p2 = pneg %p2284_p0  ;;  %p2291_p3 = por %p2290_p1, %p2289_p4 }
  0x73   : > { %p2292_p10 = pnand %p2291_p3, %p2285_p2 }
  0x75   : > { %2295 = shalt.err (!%p2292_p10)
}
  0x76   : > { %s2296_s12 = scalar_lea.vmem %s2787_s3, 128  ;;  %s2544_s27 = smov [#allocation5]  }
  0x77   : > { %p2297_p12 = scmp.ne.s32.totalorder %s2787_s3, %s2296_s12  ;;  %s2301_s22 = sshll.u32 %s2544_s27, 4  ;;  %s2302_s22 = int_to_ptr.vmem [resolvable:$false] %s2301_s22 }
  0x78   : > { %s2303_s29 = scalar_lea.vmem %s2302_s22, 256  ;;  %p2304_p6 = scmp.lt.s32.totalorder %s2787_s3, %s2302_s22 }
  0x79   : > { %p2299_p0 = pnand %p2297_p12, %p2797_p13  ;;  %p2305_p8 = scmp.lt.s32.totalorder %s2303_s29, %s2296_s12 }
  0x7b   : > { %p2300_p5 = pneg %p2299_p0  ;;  %p2306_p7 = por %p2305_p8, %p2304_p6 }
  0x7d   : > { %p2307_p9 = pnand %p2306_p7, %p2300_p5 }
  0x7f   : > { %2310 = shalt.err (!%p2307_p9)
}
  0x80   : > { %2138 = dma.hbm_to_vmem [thread:$0]  (!%p2775_p11), %s2784_s13, 128, %s2787_s3, %s2791_s14  }
  0x81   : > { %s2311_s7 = scalar_lea.hbm %s3164_s5, 512  ;;  %p3226_p3 = scmp.ne.s32.totalorder %s3214_s17, 0 }
  0x82   : > { %p2312_p1 = scmp.ne.s32.totalorder %s3164_s5, %s2311_s7  ;;  %p2318_p5 = scmp.lt.u32.totalorder %s2311_s7, %s3164_s5 }
  0x84   : > { %p2314_p6 = pnand %p2312_p1, %p3226_p3 }
  0x86   : > { %p2315_p8 = pneg %p2314_p6 }
  0x88   : > { %p2320_p10 = pnand %p2318_p5, %p2315_p8 }
  0x8a   : > { %2323 = shalt.err (!%p2320_p10)
}
  0x8b   : > { %s2324_s29 = scalar_lea.vmem %s413_s28, 512  ;;  %p2332_p0 = scmp.lt.s32.totalorder %s413_s28, %s413_s28 }
  0x8c   : > { %p2325_p2 = scmp.ne.s32.totalorder %s413_s28, %s2324_s29  ;;  %p2333_p7 = scmp.lt.s32.totalorder %s2324_s29, %s2324_s29 }
  0x8e   : > { %p2327_p4 = pnand %p2325_p2, %p3226_p3  ;;  %p2334_p9 = por %p2333_p7, %p2332_p0 }
  0x90   : > { %p2328_p12 = pneg %p2327_p4 }
  0x92   : > { %p2335_p11 = pnand %p2334_p9, %p2328_p12 }
  0x94   : > { %2338 = shalt.err (!%p2335_p11)
}
  0x95   : > { %p3227_p1 = scmp.ne.s32.totalorder %s3212_s23, 0  ;;  %s3228_s1 = smov 8  }
  0x96   : > { %s3229_s3 = smov 128   ;;  %s2545_s18 = smov [#allocation13]  }
  0x97   : > { %2125 = dma.hbm_to_vmem [thread:$0]  (!%p3227_p1), %s3164_s5, 512, %s413_s28, [#allocation9], %s3229_s3, %s3229_s3, %s3228_s1  }
  0x98   : > { %s442_s7 = sshll.u32 %s2545_s18, 4  ;;  %s2339_s22 = scalar_lea.hbm %s3167_s8, 16  ;;  %s443_s7 = int_to_ptr.vmem [resolvable:$true] %s442_s7 }
  0x99   : > { %p2340_p11 = scmp.ne.s32.totalorder %s3167_s8, %s2339_s22  ;;  %p2346_p5 = scmp.lt.u32.totalorder %s2339_s22, %s3167_s8 }
  0x9b   : > { %p2342_p6 = pnand %p2340_p11, %p3226_p3 }
  0x9d   : > { %p2343_p8 = pneg %p2342_p6 }
  0x9f   : > { %p2348_p10 = pnand %p2346_p5, %p2343_p8 }
  0xa1   : > { %2351 = shalt.err (!%p2348_p10)
}
  0xa2   : > { %s2352_s28 = scalar_lea.vmem %s443_s7, 16  ;;  %s2359_s1 = scalar_lea.vmem %s443_s7, 32 }
  0xa3   : > { %p2353_p2 = scmp.ne.s32.totalorder %s443_s7, %s2352_s28  ;;  %p2360_p0 = scmp.lt.s32.totalorder %s443_s7, %s443_s7 }
  0xa4   : > { %p2361_p7 = scmp.lt.s32.totalorder %s2359_s1, %s2352_s28 }
  0xa5   : > { %p2355_p4 = pnand %p2353_p2, %p3226_p3 }
  0xa6   : > { %p2362_p9 = por %p2361_p7, %p2360_p0 }
  0xa7   : > { %p2356_p12 = pneg %p2355_p4 }
  0xa9   : > { %p2363_p13 = pnand %p2362_p9, %p2356_p12 }
  0xab   : > { %2366 = shalt.err (!%p2363_p13)
}
  0xac   : > { %2131 = dma.hbm_to_vmem [thread:$0]  (!%p3227_p1), %s3167_s8, 16, %s443_s7, [#allocation12]  }
  0xad   : > { %s2865_s17 = scalar_lea.hbm %s3159_s0, %s2773_s11  ;;  %s469_s13 = scalar_lea.vmem [#allocation2], %s2770_s10 }
  0xae   : > { %s476_s16 = sshll.u32 %s469_s13, 4  ;;  %s3230_s23 = sand.u32 1, %s2533_s15   ;;  %s477_s16 = int_to_ptr.vmem [resolvable:$true] %s476_s16 }
  0xaf   : > { %s466_s18 = scalar_lea.sflag [#allocation3], %s3230_s23  ;;  %s2367_s27 = scalar_lea.hbm %s2865_s17, 128 }
  0xb0   : > { %p2368_p13 = scmp.ne.s32.totalorder %s2865_s17, %s2367_s27  ;;  %p3231_p3 = scmp.ne.s32.totalorder %s3225_s25, 0 }
  0xb1   : > { %s2372_s22 = scalar_lea.hbm %s3159_s0, 256  ;;  %p2373_p1 = scmp.lt.u32.totalorder %s2865_s17, %s3159_s0 }
  0xb2   : > { %p2370_p11 = pnand %p2368_p13, %p3231_p3  ;;  %p2374_p8 = scmp.lt.u32.totalorder %s2372_s22, %s2367_s27 }
  0xb3   : > { %p2376_p10 = scmp.lt.u32.totalorder %s2367_s27, %s2865_s17 }
  0xb4   : > { %p2371_p6 = pneg %p2370_p11  ;;  %p2375_p5 = por %p2374_p8, %p2373_p1 }
  0xb6   : > { %p2377_p2 = por %p2376_p10, %p2375_p5 }
  0xb8   : > { %p2378_p4 = pnand %p2377_p2, %p2371_p6 }
  0xba   : > { %2381 = shalt.err (!%p2378_p4)
}
  0xbb   : > { %s2382_s1 = scalar_lea.vmem %s477_s16, 128  ;;  %s2546_s24 = smov [#allocation2]  }
  0xbc   : > { %p2383_p12 = scmp.ne.s32.totalorder %s477_s16, %s2382_s1  ;;  %s2387_s3 = sshll.u32 %s2546_s24, 4  ;;  %s2388_s3 = int_to_ptr.vmem [resolvable:$false] %s2387_s3 }
  0xbd   : > { %s2389_s4 = scalar_lea.vmem %s2388_s3, 256  ;;  %p2390_p9 = scmp.lt.s32.totalorder %s477_s16, %s2388_s3 }
  0xbe   : > { %p2385_p0 = pnand %p2383_p12, %p3231_p3  ;;  %p2391_p13 = scmp.lt.s32.totalorder %s2389_s4, %s2382_s1 }
  0xc0   : > { %p2386_p7 = pneg %p2385_p0  ;;  %p2392_p11 = por %p2391_p13, %p2390_p9 }
  0xc2   : > { %p2393_p1 = pnand %p2392_p11, %p2386_p7 }
  0xc4   : > { %2396 = shalt.err (!%p2393_p1)
}
  0xc5   : > { %p3232_p8 = scmp.ne.s32.totalorder %s3223_s26, 0  ;;  %s2891_s23 = scalar_lea.hbm %s3161_s2, %s2773_s11 }
  0xc6   : > { %s505_s27 = scalar_lea.vmem [#allocation7], %s2770_s10  ;;  %s2397_s12 = scalar_lea.hbm %s2891_s23, 128 }
  0xc7   : > { %2135 = dma.hbm_to_vmem [thread:$0]  (!%p3232_p8), %s2865_s17, 128, %s477_s16, %s466_s18  }
  0xc8   : > { %s512_s7 = sshll.u32 %s505_s27, 4  ;;  %p2398_p6 = scmp.ne.s32.totalorder %s2891_s23, %s2397_s12  ;;  %s513_s7 = int_to_ptr.vmem [resolvable:$true] %s512_s7 }
  0xc9   : > { %s2402_s17 = scalar_lea.hbm %s3161_s2, 256  ;;  %p2403_p2 = scmp.lt.u32.totalorder %s2891_s23, %s3161_s2 }
  0xca   : > { %p2400_p5 = pnand %p2398_p6, %p3231_p3  ;;  %p2404_p4 = scmp.lt.u32.totalorder %s2402_s17, %s2397_s12 }
  0xcb   : > { %p2406_p0 = scmp.lt.u32.totalorder %s2397_s12, %s2891_s23 }
  0xcc   : > { %p2401_p10 = pneg %p2400_p5  ;;  %p2405_p12 = por %p2404_p4, %p2403_p2 }
  0xce   : > { %p2407_p7 = por %p2406_p0, %p2405_p12 }
  0xd0   : > { %p2408_p9 = pnand %p2407_p7, %p2401_p10 }
  0xd2   : > { %2411 = shalt.err (!%p2408_p9)
}
  0xd3   : > { %s2412_s10 = scalar_lea.vmem %s513_s7, 128  ;;  %s2547_s11 = smov [#allocation7]  }
  0xd4   : > { %p2413_p13 = scmp.ne.s32.totalorder %s513_s7, %s2412_s10  ;;  %s2417_s28 = sshll.u32 %s2547_s11, 4  ;;  %s2418_s28 = int_to_ptr.vmem [resolvable:$false] %s2417_s28 }
  0xd5   : > { %s2419_s1 = scalar_lea.vmem %s2418_s28, 256  ;;  %p2420_p6 = scmp.lt.s32.totalorder %s513_s7, %s2418_s28 }
  0xd6   : > { %p2415_p11 = pnand %p2413_p13, %p3231_p3  ;;  %p2421_p5 = scmp.lt.s32.totalorder %s2419_s1, %s2412_s10 }
  0xd8   : > { %p2416_p1 = pneg %p2415_p11  ;;  %p2422_p8 = por %p2421_p5, %p2420_p6 }
  0xda   : > { %p2423_p2 = pnand %p2422_p8, %p2416_p1 }
  0xdc   : > { %2426 = shalt.err (!%p2423_p2)
}
  0xdd   : > { %p3233_p4 = scmp.ne.s32.totalorder %s3223_s26, 0  ;;  %p3234_p10 = scmp.ne.s32.totalorder %s3211_s20, 0 }
  0xde   : > { %s2915_s25 = sand.u32 (!%p3234_p10), 1, %s2529_s30   ;;  %p3235_p3 = scmp.ne.s32.totalorder (!%p3234_p10), %s3218_s21, 0 }
  0xdf   : > { %2141 = dma.hbm_to_vmem [thread:$0]  (!%p3233_p4), %s2891_s23, 128, %s513_s7, %s2791_s14  }
  0xe0   : > { %521 = sbr.rel (%p3234_p10) target bundleno = 2460 (0x99c), region = 72  ;;  %s2918_s24 = sshll.u32 (!%p3234_p10), %s2915_s25, 3 }
  0xe1   : > { %s524_s3 = scalar_lea.sflag (!%p3234_p10), [#allocation3], %s2915_s25  ;;  %s527_s4 = scalar_lea.vmem (!%p3234_p10), [#allocation2], %s2918_s24 }
  0xe7   : > { %2500 = dma.done.wait (%p3235_p3), %s524_s3, 128  }
  0xe8   : > { %2502 = vsyncadd (%p3235_p3), %s524_s3, 4294967168  ;;  %s532_s20 = sand.u32 1, %s2656_s19   ;;  %s536_s26 = scalar_lea.vmem [#allocation5], %s2918_s24 }
  0xe9   : > { %s533_s14 = scalar_lea.sflag [#allocation6], %s532_s20 }
  0xea   : > { %2504 = dma.done.wait (%p3235_p3), %s533_s14, 256  }
  0xeb   : > { %2506 = vsyncadd (%p3235_p3), %s533_s14, 4294967040  ;;  %s545_s9 = scalar_lea.vmem [#allocation7], %s2918_s24  ;;  %p3236_p8 = scmp.eq.s32.totalorder %s2656_s19, 0 }
  0xed   : > { %2508 = dma.done.wait (%p3236_p8), [#allocation9], 1024   ;;  %p3237_p12 = pmov %p3236_p8 }
  0xee   : > { %p3238_p0 = pmov %p3236_p8 }
  0xef   : > { %2510 = vsyncadd (%p3237_p12), [#allocation9], 4294966272 }
  0xf0   : > { %2512 = dma.done.wait (%p3238_p0), [#allocation12], 528   ;;  %p3239_p7 = pmov %p3238_p0 }
  0xf1   : > { %v2548_v0 = vmov 0.0|0.0   ;;  %vm2549_vm0 = vmmov 0   ;;  %v2550_v1 = vmov 0.0   ;;  %v709_v2 = vld [vmem:[#allocation10] sm:$0xff]  ;;  %v710_v3 = vld [vmem:[#allocation10 + $0x8] sm:$0xff]  ;;  %v711_v7 = vld [vmem:[#allocation10 + $0x10] sm:$0xff] }
  0xf2   : > { %2514 = vsyncadd (%p3239_p7), [#allocation12], 4294966768  ;;  %2075 = vmatprep.subr.bf16.mxu1 %v2548_v0  ;;  %2069 = vmatprep.subr.bf16.mxu0 %v2548_v0  ;;  %v624_v4 = vld [vmem:[#allocation8] sm:$0xff]  ;;  %v2076_v5 = vpack.c.bf16 %v710_v3, %v709_v2  ;;  %v625_v6 = vld [vmem:[#allocation8 + $0x8] sm:$0xff]  ;;  %vm635_vm1 = vcmask 261120   ;;  %s3240_s7 = sld [smem:[#allocation31_spill]] }
  0xf3   : > { %2004 = vmatprep.mubr.msk.f32.mxu1 %vm2549_vm0, %v2550_v1  ;;  %1993 = vmatprep.mubr.msk.f32.mxu0 %vm2549_vm0, %v2550_v1  ;;  %v712_v8 = vld [vmem:[#allocation10 + $0x18] sm:$0xff]  ;;  %v2070_v9 = vpack.c.bf16 %v625_v6, %v624_v4  ;;  %v626_v10 = vld [vmem:[#allocation8 + $0x10] sm:$0xff]  ;;  %v622_v14 = vld [vmem:[%s536_s26] sm:$0xff]  ;;  %vm878_vm2 = vcmask 64512   ;;  %s2551_s12 = smov 120   ;;  %s2552_s22 = smov 112  }
  0xf4   : > { %v627_v11 = vld [vmem:[#allocation8 + $0x18] sm:$0xff]  ;;  %2077 = vmatpush3.bf16.msra.mxu1 %v2076_v5  ;;  %v2079_v12 = vpack.c.bf16 %v712_v8, %v711_v7  ;;  %v1918_v16 = vld [vmem:[%s3165_s6] ss:$0 sm:$0xff]  ;;  %s2553_s29 = smov 104   ;;  %v793_v25 = vld [vmem:[#allocation11] sm:$0xff]  ;;  %s1915_s17 = sshll.u32 %s2915_s25, 5 }
  0xf5   : > { %2071 = vmatpush3.bf16.msra.mxu0 %v2070_v9  ;;  %2078 = vmatprep.subr.bf16.mxu1 %v2548_v0  ;;  %v2073_v13 = vpack.c.bf16 %v627_v11, %v626_v10  ;;  %v2953_v15 = vld [vmem:[%s527_s4] sm:$0xff]  ;;  %v794_v26 = vld [vmem:[#allocation11 + $0x8] sm:$0xff]  ;;  %v1920_v40 = vld [vmem:[#allocation13] ss:$0 sm:$0xff]  ;;  %s3005_s16 = scalar_lea.vmem [#allocation15], %s1915_s17  ;;  %s3241_s11 = sld [smem:[#allocation33_spill]] }
  0xf6   : > { %2072 = vmatprep.subr.bf16.mxu0 %v2548_v0  ;;  %v795_v27 = vld [vmem:[#allocation11 + $0x10] sm:$0xff]  ;;  %v2082_v28 = vpack.c.bf16 %v794_v26, %v793_v25  ;;  %v796_v29 = vld [vmem:[#allocation11 + $0x18] sm:$0xff]  ;;  %s2554_s26 = smov 8   ;;  %s2556_s21 = smov 24   ;;  %vm1555_vm3 = vcmask 130048   ;;  %vm1557_vm4 = vcmask 195584  }
  0xf7   : > { %v2085_v30 = vpack.c.bf16 %v796_v29, %v795_v27  ;;  %v623_v31 = vld [vmem:[%s545_s9] sm:$0xff]  ;;  %s2555_s9 = smov 16   ;;  %s3242_s27 = sld [smem:[#allocation34_spill]] }
  0xf8   : > { %2080 = vmatpush3.bf16.msra.mxu1 %v2079_v12  ;;  %v1916_v17 = vld [vmem:[%s3240_s7] ss:$0 sm:$0xff]  ;;  %s3243_s7 = sld [smem:[#allocation27_spill]]  ;;  %s3244_s18 = sld [smem:[#allocation38_spill]] }
  0xf9   : > { %2074 = vmatpush3.bf16.msra.mxu0 %v2073_v13  ;;  %2018 = vmatprep.subr.mxu1 %v2550_v1  ;;  %s1681_s28 = scalar_lea.sflag [#allocation16], %s2915_s25  ;;  %s2557_s3 = smov [#allocation15]  }
  0xfa   : > { %2081 = vmatprep.subr.bf16.mxu0 %v2548_v0  ;;  %s2431_s4 = sshll.u32 %s2557_s3, 4  ;;  %s2432_s4 = int_to_ptr.vmem [resolvable:$false] %s2431_s4 }
  0xfb   : > { %2005 = vmatmul.mubr.msk.f32.vlgmr.msra.gmra.mrb[0].mxu1 %vm635_vm1, %v622_v14 }
  0xfc   : > { %1994 = vmatmul.mubr.msk.f32.vlgmr.msra.gmra.mrb[0].mxu0 %vm635_vm1, %v2953_v15  ;;  %2020 = vmatprep.mubr.msk.f32.mxu1 %vm2549_vm0, %v2550_v1 }
  0xfd   : > { %2015 = vmatprep.mubr.msk.f32.mxu0 %vm2549_vm0, %v2550_v1  ;;  %2083 = vmatpush3.bf16.msra.mxu0 %v2082_v28 }
  0xfe   : > { %2084 = vmatprep.subr.bf16.mxu0 %v2548_v0  ;;  %p3245_p13 = scmp.ne.s32.totalorder %s3243_s7, 0 }
 0x101   : > { %2086 = vmatpush3.bf16.msra.mxu0 %v2085_v30  ;;  %v1559_v30 = vld [vmem:[%s3241_s11] sm:$0xff] }
 0x102   : > { %2038 = vmatprep.subr.mxu0 %v2550_v1 }
 0x104   : > { %2016 = vmatmul.mubr.msk.f32.vlgmr.msra.gmra.mrb[2].mxu0 %vm635_vm1, %v623_v31  ;;  %v1560_v31 = vld [vmem:[%s3241_s11 + $0x8] sm:$0xff] }
 0x105   : > { %2040 = vmatprep.mubr.msk.f32.mxu0 %vm2549_vm0, %v2550_v1 }
 0x1ce   : > { %v789_v18 = vpop.f32.mrb[0].mxu1 }
 0x1cf   : > { %v790_v19 = vadd.f32 %v1918_v16, %v789_v18  ;;  %v705_v20 = vpop.f32.mrb[0].mxu0  ;;  %v2006_v21 = vpop.f32.mrb[1].mxu1 }
 0x1d0   : > { %v706_v22 = vadd.f32 %v1916_v17, %v705_v20  ;;  %v1995_v23 = vpop.f32.mrb[1].mxu0 }
 0x1d1   : > { %1042 = vrot.lane.b32.xlu1 %v790_v19, %s2551_s12  ;;  %2019 = vmatpush3.xpose.msk.msra.mxu1 %vm878_vm2, %v790_v19 }
 0x1d2   : > { %v877_v24 = vmul.f32 0.35355338, %v706_v22  ;;  %2023 = vmatprep.subr.mxu1 %v2550_v1 }
 0x1d4   : > { %2021 = vmatmul.mubr.msk.f32.vlgmr.msra.gmra.mrb[2].mxu1 %vm878_vm2, %v877_v24 }
 0x1d5   : > { %1040 = vrot.lane.b32.xlu1 %v877_v24, %s2551_s12  ;;  %2025 = vmatprep.mubr.msk.f32.mxu1 %vm2549_vm0, %v2550_v1 }
 0x1d7   : > { %v873_v41 = vpop.f32.mrb[2].mxu0 }
 0x1d8   : > { %v2989_v42 = vadd.f32 %v1920_v40, %v873_v41  ;;  %v2017_v43 = vpop.f32.mrb[3].mxu0 }
 0x1d9   : > { %1208 = vrot.lane.b32.xlu1 %v877_v24, %s2552_s22 }
 0x1da   : > { %2024 = vmatpush3.msra.mxu1 %v2989_v42 }
 0x1db   : > { %2028 = vmatprep.subr.mxu1 %v2550_v1 }
 0x1dd   : > { %1377 = vrot.lane.b32.xlu1 %v790_v19, %s2553_s29 }
 0x1e1   : > { %1375 = vrot.lane.b32.xlu1 %v877_v24, %s2553_s29 }
 0x243   : > { %v1043_v44 = vpop.permute.xlu1 %1042 }
 0x247   : > { %v1041_v45 = vpop.permute.xlu1 %1040 }
 0x24b   : > { %v1209_v46 = vpop.permute.xlu1 %1208 }
 0x24f   : > { %v1378_v49 = vpop.permute.xlu1 %1377 }
 0x253   : > { %v1376_v51 = vpop.permute.xlu1 %1375 }
 0x2a7   : > { %v951_v32 = vpop.f32.mrb[2].mxu1 }
 0x2a8   : > { %v2022_v33 = vpop.f32.mrb[3].mxu1  ;;  %v955_v34 = vsel %vm878_vm2, %v951_v32, -inf }
 0x2a9   : > { %956 = vmax.xlane.f32.xlu0 %v955_v34  ;;  %v1561_v33 = vld [vmem:[%s3241_s11 + $0x10] sm:$0xff] }
 0x336   : > { %v957_v35 = vpop.xlane.xlu0 %956 }
 0x337   : > { %v958_v36 = vsub.f32 %v951_v32, %v957_v35  ;;  %v2088_v32 = vpack.c.bf16 %v1560_v31, %v1559_v30 }
 0x339   : > { %v959_v37 = vmul.f32 1.442695, %v958_v36 }
 0x33b   : > { %2207 = vpow2.f32 %v959_v37 }
 0x345   : > { %v2208_v38 = vpop.eup %2207 }
 0x346   : > { %v961_v39 = vsel %vm878_vm2, %v2208_v38, 0.0 }
 0x347   : > { %962 = vadd.xlane.f32.xlu0 %v961_v39 }
 0x35d   : > { %1210 = vrot.lane.b32.xlu0 %v790_v19, %s2552_s22 }
 0x3d4   : > { %v963_v47 = vpop.xlane.xlu0 %962 }
 0x3d5   : > { %2209 = vrcp.f32 %v963_v47 }
 0x3d8   : > { %v1211_v48 = vpop.permute.xlu0 %1210 }
 0x3d9   : > { %2039 = vmatpush3.xpose.msk.msra.mxu0 %vm878_vm2, %v1211_v48 }
 0x3da   : > { %2048 = vmatprep.subr.mxu0 %v2550_v1 }
 0x3dc   : > { %2041 = vmatmul.mubr.msk.f32.vlgmr.msra.gmra.mrb[4].mxu0 %vm878_vm2, %v1209_v46  ;;  %v1937_v46 = vld [vmem:[%s3242_s27] ss:$0 sm:$0xff] }
 0x3dd   : > { %2049 = vmatpush3.xpose.msk.msra.mxu0 %vm878_vm2, %v1378_v49  ;;  %2050 = vmatprep.mubr.msk.f32.mxu0 %vm2549_vm0, %v2550_v1 }
 0x3de   : > { %2087 = vmatprep.subr.bf16.mxu0 %v2548_v0 }
 0x3df   : > { %v2210_v50 = vpop.eup %2209 }
 0x3e0   : > { %v965_v52 = vmul.f32 %v2210_v50, %v2208_v38  ;;  %2051 = vmatmul.mubr.msk.f32.vlgmr.msra.gmra.mrb[6].mxu0 %vm878_vm2, %v1376_v51 }
 0x3e1   : > { %2066 = vmatprep.mubr.msk.f32.mxu0 %vm2549_vm0, %v2550_v1  ;;  %2089 = vmatpush3.bf16.msra.mxu0 %v2088_v32 }
 0x3e2   : > { %966 = vst.msk [vmem:[%s3005_s16] sm:$0xff] %vm878_vm2, %v965_v52  ;;  %2026 = vmatmul.mubr.msk.f32.vlgmr.msra.gmra.mrb[4].mxu1 %vm878_vm2, %v965_v52  ;;  %2090 = vmatprep.subr.bf16.mxu0 %v2548_v0 }
 0x3e3   : > { %2029 = vmatpush3.xpose.msk.msra.mxu1 %vm878_vm2, %v1043_v44  ;;  %2030 = vmatprep.mubr.msk.f32.mxu1 %vm2549_vm0, %v2550_v1 }
 0x3e4   : > { %2033 = vmatprep.subr.mxu1 %v2550_v1 }
 0x3e6   : > { %2031 = vmatmul.mubr.msk.f32.vlgmr.msra.gmra.mrb[6].mxu1 %vm878_vm2, %v1041_v45 }
 0x3e7   : > { %2035 = vmatprep.mubr.msk.f32.mxu1 %vm2549_vm0, %v2550_v1 }
 0x4af   : > { %v1282_v53 = vpop.f32.mrb[4].mxu0 }
 0x4b0   : > { %v2042_v54 = vpop.f32.mrb[5].mxu0  ;;  %v1286_v55 = vsel %vm878_vm2, %v1282_v53, -inf }
 0x4b1   : > { %1287 = vmax.xlane.f32.xlu0 %v1286_v55 }
 0x4b3   : > { %v1449_v56 = vpop.f32.mrb[6].mxu0 }
 0x4b4   : > { %v2052_v57 = vpop.f32.mrb[7].mxu0  ;;  %v1453_v63 = vsel %vm878_vm2, %v1449_v56, -inf }
 0x4b5   : > { %v3018_v58 = vpop.f32.mrb[4].mxu1 }
 0x4b6   : > { %v2027_v59 = vpop.f32.mrb[5].mxu1 }
 0x4b9   : > { %v1114_v60 = vpop.f32.mrb[6].mxu1 }
 0x4ba   : > { %v2032_v61 = vpop.f32.mrb[7].mxu1  ;;  %v1118_v62 = vsel %vm878_vm2, %v1114_v60, -inf }
 0x4bb   : > { %1119 = vmax.xlane.f32.xlu1 %v1118_v62 }
 0x4bf   : > { %1454 = vmax.xlane.f32.xlu1 %v1453_v63 }
 0x53e   : > { %v1288_v2 = vpop.xlane.xlu0 %1287 }
 0x53f   : > { %v1289_v3 = vsub.f32 %v1282_v53, %v1288_v2 }
 0x541   : > { %v1290_v4 = vmul.f32 1.442695, %v1289_v3 }
 0x543   : > { %2211 = vpow2.f32 %v1290_v4 }
 0x548   : > { %v1120_v5 = vpop.xlane.xlu1 %1119 }
 0x549   : > { %v1121_v13 = vsub.f32 %v1114_v60, %v1120_v5 }
 0x54b   : > { %v1122_v14 = vmul.f32 1.442695, %v1121_v13 }
 0x54c   : > { %v1455_v6 = vpop.xlane.xlu1 %1454 }
 0x54d   : > { %v2212_v7 = vpop.eup %2211  ;;  %v1456_v8 = vsub.f32 %v1449_v56, %v1455_v6 }
 0x54e   : > { %v1292_v9 = vsel %vm878_vm2, %v2212_v7, 0.0 }
 0x54f   : > { %v1457_v10 = vmul.f32 1.442695, %v1456_v8  ;;  %1293 = vadd.xlane.f32.xlu0 %v1292_v9 }
 0x551   : > { %2213 = vpow2.f32 %v1457_v10 }
 0x552   : > { %2215 = vpow2.f32 %v1122_v14 }
 0x55b   : > { %v2214_v11 = vpop.eup %2213 }
 0x55c   : > { %v1459_v12 = vsel %vm878_vm2, %v2214_v11, 0.0  ;;  %v2216_v16 = vpop.eup %2215 }
 0x55d   : > { %1460 = vadd.xlane.f32.xlu1 %v1459_v12  ;;  %v1124_v17 = vsel %vm878_vm2, %v2216_v16, 0.0 }
 0x565   : > { %1132 = vrot.lane.b32.xlu0 %v2989_v42, %s2551_s12  ;;  %s1948_s12 = sshll.u32 %s2656_s19, 9 }
 0x566   : > { %s3074_s10 = scalar_lea.hbm %s3244_s18, %s1948_s12 }
 0x56e   : > { %1299 = vrot.lane.b32.xlu1 %v2989_v42, %s2552_s22  ;;  %s1707_s22 = sshll.u32 %s3005_s16, 4  ;;  %s3076_s22 = int_to_ptr.vmem [resolvable:$true] %s1707_s22 }
 0x56f   : > { %s2427_s1 = scalar_lea.vmem %s3076_s22, 512  ;;  %p2434_p6 = scmp.lt.s32.totalorder %s3076_s22, %s2432_s4 }
 0x570   : > { %p2428_p9 = scmp.ne.s32.totalorder %s3076_s22, %s2427_s1 }
 0x572   : > { %p2429_p11 = pnand %p2428_p9, %p3245_p13 }
 0x574   : > { %p2430_p1 = pneg %p2429_p11 }
 0x592   : > { %1125 = vadd.xlane.f32.xlu1 %v1124_v17 }
 0x5a3   : > { %1466 = vrot.lane.b32.xlu1 %v2989_v42, %s2553_s29 }
 0x5dc   : > { %v1294_v18 = vpop.xlane.xlu0 %1293 }
 0x5dd   : > { %2217 = vrcp.f32 %v1294_v18 }
 0x5e0   : > { %v1133_v19 = vpop.permute.xlu0 %1132 }
 0x5e1   : > { %2034 = vmatpush3.msra.mxu1 %v1133_v19 }
 0x5e2   : > { %2043 = vmatprep.subr.mxu1 %v2550_v1 }
 0x5e7   : > { %v2218_v20 = vpop.eup %2217 }
 0x5e8   : > { %v1296_v21 = vmul.f32 %v2218_v20, %v2212_v7 }
 0x5ea   : > { %1931 = vst.msk [vmem:[%s3005_s16 + $0x10] sm:$0xff] %vm878_vm2, %v1296_v21  ;;  %v1461_v22 = vpop.xlane.xlu1 %1460 }
 0x5eb   : > { %2219 = vrcp.f32 %v1461_v22 }
 0x5ee   : > { %v1300_v25 = vpop.permute.xlu1 %1299 }
 0x5f5   : > { %v2220_v23 = vpop.eup %2219 }
 0x5f6   : > { %v1463_v24 = vmul.f32 %v2220_v23, %v2214_v11 }
 0x5f8   : > { %1935 = vst.msk [vmem:[%s3005_s16 + $0x18] sm:$0xff] %vm878_vm2, %v1463_v24 }
 0x61f   : > { %v1126_v26 = vpop.xlane.xlu1 %1125 }
 0x620   : > { %2221 = vrcp.f32 %v1126_v26 }
 0x623   : > { %v1467_v29 = vpop.permute.xlu1 %1466 }
 0x62a   : > { %v2222_v27 = vpop.eup %2221 }
 0x62b   : > { %v1128_v28 = vmul.f32 %v2222_v27, %v2216_v16 }
 0x62d   : > { %1927 = vst.msk [vmem:[%s3005_s16 + $0x8] sm:$0xff] %vm878_vm2, %v1128_v28  ;;  %2036 = vmatmul.mubr.msk.f32.vlgmr.msra.gmra.mrb[8].mxu1 %vm878_vm2, %v1128_v28  ;;  %s2433_s16 = scalar_lea.vmem %s2432_s4, 1024 }
 0x62e   : > { %2044 = vmatpush3.msra.mxu1 %v1300_v25  ;;  %2045 = vmatprep.mubr.msk.f32.mxu1 %vm2549_vm0, %v2550_v1  ;;  %p2435_p5 = scmp.lt.s32.totalorder %s2433_s16, %s2427_s1 }
 0x62f   : > { %2053 = vmatprep.subr.mxu1 %v2550_v1 }
 0x630   : > { %p2436_p2 = por %p2435_p5, %p2434_p6 }
 0x631   : > { %2046 = vmatmul.mubr.msk.f32.vlgmr.msra.gmra.mrb[10].mxu1 %vm878_vm2, %v1296_v21 }
 0x632   : > { %2054 = vmatpush3.msra.mxu1 %v1467_v29  ;;  %2055 = vmatprep.mubr.msk.f32.mxu1 %vm2549_vm0, %v2550_v1  ;;  %v1562_v1 = vld [vmem:[%s3241_s11 + $0x18] sm:$0xff]  ;;  %p2437_p4 = pnand %p2436_p2, %p2430_p1 }
 0x633   : > { %v2091_v34 = vpack.c.bf16 %v1562_v1, %v1561_v33 }
 0x635   : > { %2056 = vmatmul.mubr.msk.f32.vlgmr.msra.gmra.mrb[12].mxu1 %vm878_vm2, %v1463_v24  ;;  %2092 = vmatpush3.bf16.msra.mxu0 %v2091_v34 }
 0x700   : > { %v1204_v35 = vpop.f32.mrb[8].mxu1 }
 0x701   : > { %1543 = vrot.lane.b32.xlu0 %v1204_v35, %s2554_s26  ;;  %v2037_v36 = vpop.f32.mrb[9].mxu1 }
 0x704   : > { %v1371_v37 = vpop.f32.mrb[10].mxu1 }
 0x705   : > { %1547 = vrot.lane.b32.xlu1 %v1371_v37, %s2555_s9  ;;  %v2047_v38 = vpop.f32.mrb[11].mxu1 }
 0x708   : > { %v1538_v0 = vpop.f32.mrb[12].mxu1 }
 0x709   : > { %1551 = vrot.lane.b32.xlu0 %v1538_v0, %s2556_s21  ;;  %v2057_v39 = vpop.f32.mrb[13].mxu1 }
 0x773   : > { %v1544_v40 = vpop.permute.xlu0 %1543 }
 0x774   : > { %v1554_v42 = vsel %vm878_vm2, %v3018_v58, %v1544_v40 }
 0x777   : > { %v1548_v41 = vpop.permute.xlu1 %1547 }
 0x778   : > { %v1556_v43 = vsel %vm1555_vm3, %v1554_v42, %v1548_v41 }
 0x77b   : > { %v1552_v44 = vpop.permute.xlu0 %1551 }
 0x77c   : > { %v1558_v45 = vsel %vm1557_vm4, %v1556_v43, %v1552_v44 }
 0x77d   : > { %2067 = vmatmul.mubr.msk.f32.vlgmr.msra.gmra.mrb[8].mxu0 %vm635_vm1, %v1558_v45 }
 0x850   : > { %v1639_v47 = vpop.f32.mrb[8].mxu0 }
 0x851   : > { %v1640_v48 = vadd.f32 %v1937_v46, %v1639_v47  ;;  %v2068_v49 = vpop.f32.mrb[9].mxu0 }
 0x853   : > { %v1643_v50 = vadd.f32 %v1640_v48, %v2953_v15 }
 0x855   : > { %v1644_v51 = vsel %vm635_vm1, %v1643_v50, 0.0 }
 0x856   : > { %1645 = vadd.xlane.f32.xlu1 %v1644_v51 }
 0x8e3   : > { %v1646_v52 = vpop.xlane.xlu1 %1645 }
 0x8e4   : > { %v1648_v53 = vmul.f32 0.03125, %v1646_v52 }
 0x8e6   : > { %v1649_v54 = vsub.f32 %v1643_v50, %v1648_v53 }
 0x8e8   : > { %v1650_v55 = vmul.f32 %v1649_v54, %v1649_v54 }
 0x8ea   : > { %v1651_v56 = vsel %vm635_vm1, %v1650_v55, 0.0 }
 0x8eb   : > { %1652 = vadd.xlane.f32.xlu0 %v1651_v56 }
 0x8ec   : > { %2440 = shalt.err (!%p2437_p4)
}
 0x8ed   : > { %s2441_s20 = scalar_lea.hbm %s3074_s10, 512  ;;  %s2445_s21 = scalar_lea.hbm %s3244_s18, 1024 }
 0x8ee   : > { %p2442_p10 = scmp.ne.s32.totalorder %s3074_s10, %s2441_s20  ;;  %p2446_p12 = scmp.lt.u32.totalorder %s3074_s10, %s3244_s18 }
 0x8ef   : > { %p2447_p0 = scmp.lt.u32.totalorder %s2445_s21, %s2441_s20  ;;  %p2449_p9 = scmp.lt.u32.totalorder %s2441_s20, %s3074_s10 }
 0x8f0   : > { %p2443_p3 = pnand %p2442_p10, %p3245_p13 }
 0x8f1   : > { %p2448_p7 = por %p2447_p0, %p2446_p12 }
 0x8f2   : > { %p2444_p8 = pneg %p2443_p3 }
 0x8f3   : > { %p2450_p11 = por %p2449_p9, %p2448_p7 }
 0x8f5   : > { %p2451_p1 = pnand %p2450_p11, %p2444_p8 }
 0x8f7   : > { %2454 = shalt.err (!%p2451_p1)
}
 0x8f8   : > { %s2558_s27 = smov 128   ;;  %s3246_s17 = sld [smem:[#allocation35_spill]] }
 0x8f9   : > { %2116 = dma.vmem_to_hbm [thread:$0]  (%p3245_p13), %s3076_s22, 512, %s3074_s10, %s1681_s28, %s2558_s27, %s2558_s27, %s2554_s26  }
 0x8fa   : > { %s3247_s4 = sld [smem:[#allocation36_spill]]  ;;  %s1943_s16 = sshll.u32 %s2656_s19, 7 }
 0x8fb   : > { %s613_s20 = scalar_lea.vmem [#allocation14], %s2918_s24  ;;  %s3248_s10 = sld [smem:[#allocation37_spill]] }
 0x8fc   : > { %s1694_s14 = sshll.u32 %s613_s20, 4  ;;  %s1676_s9 = scalar_lea.sflag [#allocation4], %s2915_s25  ;;  %s3116_s14 = int_to_ptr.vmem [resolvable:$true] %s1694_s14 }
 0x8fd   : > { %s2455_s21 = scalar_lea.vmem %s3116_s14, 128  ;;  %s2559_s19 = smov [#allocation14]  }
 0x8fe   : > { %v1939_v60 = vld [vmem:[%s3246_s17] ss:$0 sm:$0xff]  ;;  %p2456_p6 = scmp.ne.s32.totalorder %s3116_s14, %s2455_s21  ;;  %s2459_s24 = sshll.u32 %s2559_s19, 4  ;;  %s2460_s24 = int_to_ptr.vmem [resolvable:$false] %s2459_s24 }
 0x8ff   : > { %s2461_s13 = scalar_lea.vmem %s2460_s24, 256  ;;  %p2462_p4 = scmp.lt.s32.totalorder %s3116_s14, %s2460_s24 }
 0x900   : > { %v1940_v62 = vld [vmem:[%s3247_s4] ss:$0 sm:$0xff]  ;;  %p2457_p5 = pnand %p2456_p6, %p3245_p13  ;;  %p2463_p10 = scmp.lt.s32.totalorder %s2461_s13, %s2455_s21 }
 0x901   : > { %s3114_s28 = scalar_lea.hbm %s3248_s10, %s1943_s16 }
 0x902   : > { %p2458_p2 = pneg %p2457_p5  ;;  %p2464_p3 = por %p2463_p10, %p2462_p4 }
 0x904   : > { %p2465_p8 = pnand %p2464_p3, %p2458_p2 }
 0x978   : > { %v1653_v15 = vpop.xlane.xlu0 %1652 }
 0x979   : > { %v1654_v57 = vmul.f32 0.03125, %v1653_v15 }
 0x97b   : > { %v1655_v58 = vadd.f32 1e-05, %v1654_v57 }
 0x97d   : > { %2223 = vrsqrt.f32 %v1655_v58 }
 0x987   : > { %v2224_v59 = vpop.eup %2223 }
 0x988   : > { %v1657_v61 = vmul.f32 %v2224_v59, %v1649_v54 }
 0x98a   : > { %v1665_v63 = vmul.f32 %v1939_v60, %v1657_v61 }
 0x98c   : > { %v1673_v2 = vadd.f32 %v1940_v62, %v1665_v63 }
 0x98e   : > { %1674 = vst.msk [vmem:[%s613_s20] sm:$0xff] %vm635_vm1, %v1673_v2 }
 0x98f   : > { %2468 = shalt.err (!%p2465_p8)
}
 0x990   : > { %s2469_s25 = scalar_lea.hbm %s3114_s28, 128  ;;  %s2473_s12 = scalar_lea.hbm %s3248_s10, 256 }
 0x991   : > { %p2470_p12 = scmp.ne.s32.totalorder %s3114_s28, %s2469_s25  ;;  %p2474_p9 = scmp.lt.u32.totalorder %s3114_s28, %s3248_s10 }
 0x992   : > { %p2475_p11 = scmp.lt.u32.totalorder %s2473_s12, %s2469_s25  ;;  %p2477_p6 = scmp.lt.u32.totalorder %s2469_s25, %s3114_s28 }
 0x993   : > { %p2471_p0 = pnand %p2470_p12, %p3245_p13 }
 0x994   : > { %p2476_p1 = por %p2475_p11, %p2474_p9 }
 0x995   : > { %p2472_p7 = pneg %p2471_p0 }
 0x996   : > { %p2478_p5 = por %p2477_p6, %p2476_p1 }
 0x998   : > { %p2479_p2 = pnand %p2478_p5, %p2472_p7 }
 0x99a   : > { %2482 = shalt.err (!%p2479_p2)
}
 0x99b   : > { %2115 = dma.vmem_to_hbm [thread:$0]  (%p3245_p13), %s3116_s14, 128, %s3114_s28, %s1676_s9  }
 0x99c PF: > { %s3249_s1 = sld [smem:[#allocation23_spill]]  ;;  %s3250_s3 = sld [smem:[#allocation28_spill]] }
 0x99d   : > { %s3251_s4 = sld [smem:[#allocation24_spill]] }
 0x9a2   : > { %s1722_s16 = sand.u32 1, %s3249_s1   ;;  %p3252_p4 = scmp.ne.s32.totalorder %s3250_s3, 0 }
 0x9a3   : > { %p3253_p10 = scmp.ge.s32.totalorder %s3251_s4, 2  ;;  %s1723_s20 = scalar_lea.sflag [#allocation4], %s1722_s16 }
 0x9a5   : > { %p2143_p3 = pnand %p3253_p10, %p3252_p4 }
 0x9a7   : > { %2516 = dma.done.wait (!%p2143_p3), %s1723_s20, 128  }
 0x9a8   : > { %2518 = vsyncadd (!%p2143_p3), %s1723_s20, 4294967168  ;;  %s1732_s26 = scalar_lea.sflag [#allocation16], %s1722_s16 }
 0x9a9   : > { %2520 = dma.done.wait (!%p2143_p3), %s1732_s26, 512  }
 0x9aa   : > { %2522 = vsyncadd (!%p2143_p3), %s1732_s26, 4294966784  ;;  %s3254_s16 = sld [smem:[#allocation25_spill]]  ;;  %s3255_s7 = sld [smem:[#allocation26_spill]] }
 0x9ab   : > { %s3256_s29 = smov %s2529_s30  ;;  %s3257_s30 = smov %s2533_s15 }
 0x9b0   : > { %p36_p13 = scmp.ge.s32.totalorder %s3254_s16, 4   ;;  %s3258_s15 = smov %s3255_s7 }
 0x9b2   :  { %38 = sbr.rel (!%p36_p13) target bundleno = 22 (0x16), region = 177 }
 0x9b9   :  { %1737 = vsyncpa [#allocation3], 1 }
 0x9ba   :  { %1739 = vsyncpa [#allocation3 + $0x1], 1 }
 0x9bb   :  { %1740 = vsyncpa [#allocation6], 1 }
 0x9bc   :  { %1742 = vsyncpa [#allocation6 + $0x1], 1 }
 0x9bd   :  { %1743 = vsyncpa [#allocation9], 1 }
 0x9be   :  { %1744 = vsyncpa [#allocation12], 1 }
 0x9bf   :  { %1745 = vsyncpa [#allocation4], 1 }
 0x9c0   :  { %1747 = vsyncpa [#allocation4 + $0x1], 1 }
 0x9c1   :  { %1748 = vsyncpa [#allocation16], 1 }
 0x9c2   :  { %1750 = vsyncpa [#allocation16 + $0x1], 1 }

</bundles_post_ra>
